<compile_context>
chip_gen: v5e
topology: v5e:2x2
jax: 0.10.0
libtpu: 0.0.40
codegen_flags: <defaults>
</compile_context>

<pallas_src>
import jax
import jax.numpy as jnp
from jax.experimental import pallas as pl
from jax.experimental.pallas import tpu as pltpu

LANE = 128


def _round_up(n, m):
    return ((n + m - 1) // m) * m


def mlp_kernel(x_ref,
               w1_ref, b1_ref,
               w2_ref, b2_ref,
               w3_ref, b3_ref,
               w4_ref, b4_ref,
               o_ref):
    cdt = w1_ref.dtype  # compute dtype (bf16 by default); MXU accumulates in f32

    # Cast the f32 input tile to the compute dtype in-kernel (cheap VPU op) so the
    # wrapper never makes an extra HBM pass over x.
    x = x_ref[...].astype(cdt)

    # inputLink + ReLU
    h = jnp.dot(x, w1_ref[...], preferred_element_type=jnp.float32)
    h = jnp.maximum(h + b1_ref[...], 0.0).astype(cdt)
    # link1 + ReLU
    h = jnp.dot(h, w2_ref[...], preferred_element_type=jnp.float32)
    h = jnp.maximum(h + b2_ref[...], 0.0).astype(cdt)
    # link2 + ReLU
    h = jnp.dot(h, w3_ref[...], preferred_element_type=jnp.float32)
    h = jnp.maximum(h + b3_ref[...], 0.0).astype(cdt)
    # predictLink (no activation)
    out = jnp.dot(h, w4_ref[...], preferred_element_type=jnp.float32) + b4_ref[...]

    o_ref[...] = out.astype(o_ref.dtype)


def prepare_params(params, compute_dtype=jnp.bfloat16):
    """One-time preparation (call once, reuse across forwards).

    * Casts weights to `compute_dtype` (bf16 by default) for the MXU.
    * Pads every *output* feature dim to a multiple of 128 lanes (lane-dense).
    * Pads the *input* feature dim of layers >= 1 to 128 (to match the padded
      activations); layer 0 keeps the raw D_in so x needs no padding.
    * Biases stay f32 (added to the f32 accumulator) and are lane-padded with 0.
    Zero padding is semantics-preserving: padded rows/cols/bias lanes contribute
    exactly 0 and ReLU(0) = 0 propagates cleanly.
    """
    prepped = []
    for li, (w, b) in enumerate(params):
        d_in, d_out = w.shape
        pd_in = d_in if li == 0 else _round_up(d_in, LANE)
        pd_out = _round_up(d_out, LANE)

        w_p = w.astype(compute_dtype)
        if (pd_in, pd_out) != (d_in, d_out):
            w_p = jnp.pad(w_p, ((0, pd_in - d_in), (0, pd_out - d_out)))

        b_p = jnp.reshape(b, (1, d_out)).astype(jnp.float32)
        if pd_out != d_out:
            b_p = jnp.pad(b_p, ((0, 0), (0, pd_out - d_out)))

        prepped.append((w_p, b_p))
    return tuple(prepped)


def net_forward(x, prepped, *, out_features=None, batch_tile=1024,
                return_padded=False):
    """Fused MLP forward.

    x: (B, D_in) float32.  prepped: output of `prepare_params`.
    Returns (B, out_features) in bf16, or the padded (B_pad, 128*k) block if
    `return_padded=True` (lets the consumer fuse the slice).
    """
    (w1, b1), (w2, b2), (w3, b3), (w4, b4) = prepped
    B, D_in = x.shape
    assert w1.shape[0] == D_in, (w1.shape, D_in)
    pD_out = w4.shape[1]
    compute_dtype = w1.dtype
    out_dtype = compute_dtype  # bf16 store: halves output HBM writeback bytes

    # Sublane packing: bf16 packs 16 rows/vreg, f32 packs 8. Use the stricter one.
    row_align = 16 if jnp.dtype(compute_dtype).itemsize == 2 else 8
    tile = min(batch_tile, _round_up(B, row_align))
    tile = _round_up(tile, row_align)
    # v7x megacore: prefer >= 2 parallel grid steps when B is non-trivial so both
    # TensorCores (and both HBM paths) get used.
    if B > row_align and _round_up(B, tile) // tile < 2:
        tile = max(row_align, _round_up(tile // 2, row_align))
    B_pad = _round_up(B, tile)

    # Only pad batch rows when needed; never pad/cast the feature dim of x.
    x_p = x if B_pad == B else jnp.pad(x, ((0, B_pad - B), (0, 0)))

    grid = (B_pad // tile,)

    def resident(a):
        # Whole array as one block, constant index map -> stays VMEM-resident
        # across grid steps.
        return pl.BlockSpec(a.shape, lambda i: (0, 0))

    out = pl.pallas_call(
        mlp_kernel,
        out_shape=jax.ShapeDtypeStruct((B_pad, pD_out), out_dtype),
        grid=grid,
        in_specs=[
            pl.BlockSpec((tile, D_in), lambda i: (i, 0)),
            resident(w1), resident(b1),
            resident(w2), resident(b2),
            resident(w3), resident(b3),
            resident(w4), resident(b4),
        ],
        out_specs=pl.BlockSpec((tile, pD_out), lambda i: (i, 0)),
        compiler_params=pltpu.CompilerParams(
            dimension_semantics=("parallel",)),
    )(x_p, w1, b1, w2, b2, w3, b3, w4, b4)

    if return_padded:
        return out
    n_out = pD_out if out_features is None else out_features
    if B_pad == B and n_out == pD_out:
        return out
    return out[:B, :n_out]


def init_params(key, input_dim, hidden, output_dim):
    """Deterministic init; weights stored as (in, out) = PyTorch W^T. Float32 master copy."""
    dims = [input_dim, hidden[0], hidden[1], hidden[2], output_dim]
    params = []
    for li, (d_in, d_out) in enumerate(zip(dims[:-1], dims[1:])):
        kw, kb, key = jax.random.split(jax.random.fold_in(key, li), 3)
        bound = 1.0 / jnp.sqrt(d_in)  # matches torch.nn.Linear default init range
        w = jax.random.uniform(kw, (d_in, d_out), jnp.float32, -bound, bound)
        b = jax.random.uniform(kb, (1, d_out), jnp.float32, -bound, bound)
        params.append((w, b))
    return params


def reference_forward(x, params, compute_dtype=jnp.bfloat16):
    """Pure-JAX reference mimicking the kernel numerics (bf16 compute, f32 accum)."""
    h = x.astype(compute_dtype)
    n = len(params)
    for i, (w, b) in enumerate(params):
        h = jnp.dot(h, w.astype(compute_dtype),
                    preferred_element_type=jnp.float32) + b
        if i < n - 1:
            h = jnp.maximum(h, 0.0).astype(compute_dtype)
    return h  # f32


def reference_forward_f32(x, params):
    (w1, b1), (w2, b2), (w3, b3), (w4, b4) = params
    h = jnp.maximum(x @ w1 + b1, 0.0)
    h = jnp.maximum(h @ w2 + b2, 0.0)
    h = jnp.maximum(h @ w3 + b3, 0.0)
    return h @ w4 + b4


if __name__ == "__main__":
    key = jax.random.PRNGKey(0)
    batch = 256               # -> tile=128, 2 parallel grid steps, no batch padding
    input_dim = 32
    hidden = (64, 64, 32)
    output_dim = 16

    kx, kp = jax.random.split(key)
    x = jax.random.normal(kx, (batch, input_dim), jnp.float32)
    params = init_params(kp, input_dim, hidden, output_dim)

    # One-time weight prep (cached); the per-call hot path is just the pallas_call.
    prepped = prepare_params(params)

    fwd = jax.jit(net_forward,
                  static_argnames=("out_features", "batch_tile", "return_padded"))
    out = fwd(x, prepped, out_features=output_dim)
    out = jax.block_until_ready(out)
    assert out.shape == (batch, output_dim), out.shape

    out_f32 = out.astype(jnp.float32)

    # Tight check vs. a reference that mimics the kernel's bf16/f32-accum numerics
    # (the kernel additionally rounds the final store to bf16).
    ref_bf16 = reference_forward(x, params)
    assert jnp.allclose(out_f32, ref_bf16, atol=2e-2, rtol=2e-2), \
        float(jnp.max(jnp.abs(out_f32 - ref_bf16)))

    # Loose sanity check vs. the pure-f32 PyTorch-equivalent forward.
    ref_f32 = reference_forward_f32(x, params)
    assert jnp.allclose(out_f32, ref_f32, atol=5e-2, rtol=5e-2), \
        float(jnp.max(jnp.abs(out_f32 - ref_f32)))

    print("KERNEL_OK")
</pallas_src>

<mosaic_0001>
module attributes {stable_mosaic.version = 11 : i64} {
  func.func @mlp_kernel(%arg0: i32, %arg1: memref<128x32xf32, #tpu.memory_space<vmem>>, %arg2: memref<32x128xbf16, #tpu.memory_space<vmem>>, %arg3: memref<1x128xf32, #tpu.memory_space<vmem>>, %arg4: memref<128x128xbf16, #tpu.memory_space<vmem>>, %arg5: memref<1x128xf32, #tpu.memory_space<vmem>>, %arg6: memref<128x128xbf16, #tpu.memory_space<vmem>>, %arg7: memref<1x128xf32, #tpu.memory_space<vmem>>, %arg8: memref<128x128xbf16, #tpu.memory_space<vmem>>, %arg9: memref<1x128xf32, #tpu.memory_space<vmem>>, %arg10: memref<128x128xbf16, #tpu.memory_space<vmem>>) attributes {dimension_semantics = [#tpu.dimension_semantics<parallel>], iteration_bounds = array<i64: 2>, scalar_prefetch = 0 : i64, scratch_operands = 0 : i64, tpu.core_type = #tpu.core_type<tc>, window_params = [{transform_indices = @transform_0, window_bounds = array<i64: 128, 32>}, {pipeline_mode = #tpu.pipeline_mode<synchronous>, transform_indices = @transform_1, window_bounds = array<i64: 32, 128>}, {pipeline_mode = #tpu.pipeline_mode<synchronous>, transform_indices = @transform_2, window_bounds = array<i64: 1, 128>}, {pipeline_mode = #tpu.pipeline_mode<synchronous>, transform_indices = @transform_3, window_bounds = array<i64: 128, 128>}, {pipeline_mode = #tpu.pipeline_mode<synchronous>, transform_indices = @transform_4, window_bounds = array<i64: 1, 128>}, {pipeline_mode = #tpu.pipeline_mode<synchronous>, transform_indices = @transform_5, window_bounds = array<i64: 128, 128>}, {pipeline_mode = #tpu.pipeline_mode<synchronous>, transform_indices = @transform_6, window_bounds = array<i64: 1, 128>}, {pipeline_mode = #tpu.pipeline_mode<synchronous>, transform_indices = @transform_7, window_bounds = array<i64: 128, 128>}, {pipeline_mode = #tpu.pipeline_mode<synchronous>, transform_indices = @transform_8, window_bounds = array<i64: 1, 128>}, {transform_indices = @transform_9, window_bounds = array<i64: 128, 128>}]} {
    %c0 = arith.constant 0 : index
    %c0_0 = arith.constant 0 : index
    %0 = vector.load %arg1[%c0, %c0_0] : memref<128x32xf32, #tpu.memory_space<vmem>>, vector<128x32xf32>
    %1 = arith.truncf %0 : vector<128x32xf32> to vector<128x32xbf16>
    %c0_1 = arith.constant 0 : index
    %c0_2 = arith.constant 0 : index
    %2 = vector.load %arg2[%c0_1, %c0_2] : memref<32x128xbf16, #tpu.memory_space<vmem>>, vector<32x128xbf16>
    %cst = arith.constant dense<0.000000e+00> : vector<128x128xf32>
    %3 = tpu.matmul %1, %2, %cst {dimension_numbers = #tpu.dot_dimension_numbers<[1], [0], [0], [1], [0, 0, 1, 1], [], []>} : vector<128x32xbf16>, vector<32x128xbf16>, vector<128x128xf32> -> vector<128x128xf32>
    %c0_3 = arith.constant 0 : index
    %c0_4 = arith.constant 0 : index
    %4 = vector.load %arg3[%c0_3, %c0_4] : memref<1x128xf32, #tpu.memory_space<vmem>>, vector<1x128xf32>
    %5 = vector.broadcast %4 : vector<1x128xf32> to vector<128x128xf32>
    %6 = arith.addf %3, %5 : vector<128x128xf32>
    %cst_5 = arith.constant 0.000000e+00 : f32
    %7 = vector.broadcast %cst_5 : f32 to vector<128x128xf32>
    %8 = arith.maximumf %6, %7 : vector<128x128xf32>
    %9 = arith.truncf %8 : vector<128x128xf32> to vector<128x128xbf16>
    %c0_6 = arith.constant 0 : index
    %c0_7 = arith.constant 0 : index
    %10 = vector.load %arg4[%c0_6, %c0_7] : memref<128x128xbf16, #tpu.memory_space<vmem>>, vector<128x128xbf16>
    %cst_8 = arith.constant dense<0.000000e+00> : vector<128x128xf32>
    %11 = tpu.matmul %9, %10, %cst_8 {dimension_numbers = #tpu.dot_dimension_numbers<[1], [0], [0], [1], [0, 0, 1, 1], [], []>} : vector<128x128xbf16>, vector<128x128xbf16>, vector<128x128xf32> -> vector<128x128xf32>
    %c0_9 = arith.constant 0 : index
    %c0_10 = arith.constant 0 : index
    %12 = vector.load %arg5[%c0_9, %c0_10] : memref<1x128xf32, #tpu.memory_space<vmem>>, vector<1x128xf32>
    %13 = vector.broadcast %12 : vector<1x128xf32> to vector<128x128xf32>
    %14 = arith.addf %11, %13 : vector<128x128xf32>
    %cst_11 = arith.constant 0.000000e+00 : f32
    %15 = vector.broadcast %cst_11 : f32 to vector<128x128xf32>
    %16 = arith.maximumf %14, %15 : vector<128x128xf32>
    %17 = arith.truncf %16 : vector<128x128xf32> to vector<128x128xbf16>
    %c0_12 = arith.constant 0 : index
    %c0_13 = arith.constant 0 : index
    %18 = vector.load %arg6[%c0_12, %c0_13] : memref<128x128xbf16, #tpu.memory_space<vmem>>, vector<128x128xbf16>
    %cst_14 = arith.constant dense<0.000000e+00> : vector<128x128xf32>
    %19 = tpu.matmul %17, %18, %cst_14 {dimension_numbers = #tpu.dot_dimension_numbers<[1], [0], [0], [1], [0, 0, 1, 1], [], []>} : vector<128x128xbf16>, vector<128x128xbf16>, vector<128x128xf32> -> vector<128x128xf32>
    %c0_15 = arith.constant 0 : index
    %c0_16 = arith.constant 0 : index
    %20 = vector.load %arg7[%c0_15, %c0_16] : memref<1x128xf32, #tpu.memory_space<vmem>>, vector<1x128xf32>
    %21 = vector.broadcast %20 : vector<1x128xf32> to vector<128x128xf32>
    %22 = arith.addf %19, %21 : vector<128x128xf32>
    %cst_17 = arith.constant 0.000000e+00 : f32
    %23 = vector.broadcast %cst_17 : f32 to vector<128x128xf32>
    %24 = arith.maximumf %22, %23 : vector<128x128xf32>
    %25 = arith.truncf %24 : vector<128x128xf32> to vector<128x128xbf16>
    %c0_18 = arith.constant 0 : index
    %c0_19 = arith.constant 0 : index
    %26 = vector.load %arg8[%c0_18, %c0_19] : memref<128x128xbf16, #tpu.memory_space<vmem>>, vector<128x128xbf16>
    %cst_20 = arith.constant dense<0.000000e+00> : vector<128x128xf32>
    %27 = tpu.matmul %25, %26, %cst_20 {dimension_numbers = #tpu.dot_dimension_numbers<[1], [0], [0], [1], [0, 0, 1, 1], [], []>} : vector<128x128xbf16>, vector<128x128xbf16>, vector<128x128xf32> -> vector<128x128xf32>
    %c0_21 = arith.constant 0 : index
    %c0_22 = arith.constant 0 : index
    %28 = vector.load %arg9[%c0_21, %c0_22] : memref<1x128xf32, #tpu.memory_space<vmem>>, vector<1x128xf32>
    %29 = vector.broadcast %28 : vector<1x128xf32> to vector<128x128xf32>
    %30 = arith.addf %27, %29 : vector<128x128xf32>
    %31 = arith.truncf %30 : vector<128x128xf32> to vector<128x128xbf16>
    %c0_23 = arith.constant 0 : index
    %c0_24 = arith.constant 0 : index
    %32 = vector.load %arg10[%c0_23, %c0_24] : memref<128x128xbf16, #tpu.memory_space<vmem>>, vector<128x128xbf16>
    tpu.vector_store %arg10[%c0_23, %c0_24], %31 {strides = array<i32>} : memref<128x128xbf16, #tpu.memory_space<vmem>>, vector<128x128xbf16>,
    return
  }
  func.func @transform_0(%arg0: i32) -> (i32, i32) {
    %c0_i32 = arith.constant 0 : i32
    %c0_i32_0 = arith.constant 0 : i32
    return %arg0, %c0_i32 : i32, i32
  }
  func.func @transform_1(%arg0: i32) -> (i32, i32) {
    %c0_i32 = arith.constant 0 : i32
    %c0_i32_0 = arith.constant 0 : i32
    %c0_i32_1 = arith.constant 0 : i32
    return %c0_i32, %c0_i32_0 : i32, i32
  }
  func.func @transform_2(%arg0: i32) -> (i32, i32) {
    %c0_i32 = arith.constant 0 : i32
    %c0_i32_0 = arith.constant 0 : i32
    %c0_i32_1 = arith.constant 0 : i32
    return %c0_i32, %c0_i32_0 : i32, i32
  }
  func.func @transform_3(%arg0: i32) -> (i32, i32) {
    %c0_i32 = arith.constant 0 : i32
    %c0_i32_0 = arith.constant 0 : i32
    %c0_i32_1 = arith.constant 0 : i32
    return %c0_i32, %c0_i32_0 : i32, i32
  }
  func.func @transform_4(%arg0: i32) -> (i32, i32) {
    %c0_i32 = arith.constant 0 : i32
    %c0_i32_0 = arith.constant 0 : i32
    %c0_i32_1 = arith.constant 0 : i32
    return %c0_i32, %c0_i32_0 : i32, i32
  }
  func.func @transform_5(%arg0: i32) -> (i32, i32) {
    %c0_i32 = arith.constant 0 : i32
    %c0_i32_0 = arith.constant 0 : i32
    %c0_i32_1 = arith.constant 0 : i32
    return %c0_i32, %c0_i32_0 : i32, i32
  }
  func.func @transform_6(%arg0: i32) -> (i32, i32) {
    %c0_i32 = arith.constant 0 : i32
    %c0_i32_0 = arith.constant 0 : i32
    %c0_i32_1 = arith.constant 0 : i32
    return %c0_i32, %c0_i32_0 : i32, i32
  }
  func.func @transform_7(%arg0: i32) -> (i32, i32) {
    %c0_i32 = arith.constant 0 : i32
    %c0_i32_0 = arith.constant 0 : i32
    %c0_i32_1 = arith.constant 0 : i32
    return %c0_i32, %c0_i32_0 : i32, i32
  }
  func.func @transform_8(%arg0: i32) -> (i32, i32) {
    %c0_i32 = arith.constant 0 : i32
    %c0_i32_0 = arith.constant 0 : i32
    %c0_i32_1 = arith.constant 0 : i32
    return %c0_i32, %c0_i32_0 : i32, i32
  }
  func.func @transform_9(%arg0: i32) -> (i32, i32) {
    %c0_i32 = arith.constant 0 : i32
    %c0_i32_0 = arith.constant 0 : i32
    return %arg0, %c0_i32 : i32, i32
  }
}

</mosaic_0001>

<bundles_post_ra>
// kernel: net_forward.1
= control target key start
LH: loop header
LB: loop body
LE: loop exit
PB: predicated region body
PF: predicated region fallthrough
CT: control target
= control target key end

     0   :  { %s1232_s30 = smov 0   ;;  %s1415_s0 = inlined_call_operand.vmem [shape: f32[256,32], index: 0, kind: input, shape index: {}]   ;;  %s1416_s1 = inlined_call_operand.vmem [shape: bf16[32,128], index: 1, kind: input, shape index: {}]   ;;  %s1417_s2 = inlined_call_operand.vmem [shape: f32[1,128], index: 2, kind: input, shape index: {}]   ;;  %s1418_s3 = inlined_call_operand.vmem [shape: bf16[128,128], index: 3, kind: input, shape index: {}]   ;;  %s1419_s4 = inlined_call_operand.vmem [shape: f32[1,128], index: 4, kind: input, shape index: {}]   ;;  %s1420_s5 = inlined_call_operand.vmem [shape: bf16[128,128], index: 5, kind: input, shape index: {}]   ;;  %s1421_s6 = inlined_call_operand.vmem [shape: f32[1,128], index: 6, kind: input, shape index: {}]   ;;  %s1422_s7 = inlined_call_operand.vmem [shape: bf16[128,128], index: 7, kind: input, shape index: {}]   ;;  %s1423_s8 = inlined_call_operand.vmem [shape: f32[1,128], index: 8, kind: input, shape index: {}]   ;;  %s1424_s9 = inlined_call_operand.vmem [shape: bf16[256,128], index: 9, kind: output, shape index: {}]  }
   0x1 LB: > { %s966_s10 = sadd.s32 4294967295, %s1180_s30   ;;  %p970_p0 = scmp.ge.s32.totalorder %s1180_s30, 1  ;;  %s1180_s30 = sphi %s1232_s30, %s19_s30  }
   0x2   : > { %p288_p1 = scmp.lt.s32.totalorder %s1180_s30, 3 }
   0x4   : > { %p289_p2 = pnand %p970_p0, %p288_p1 }
   0x5   : > { %s971_s13 = sshll.u32 (!%p289_p2), %s966_s10, 4 }
   0x6   : > { %292 = sbr.rel (%p289_p2) target bundleno = 702 (0x2be), region = 56  ;;  %p325_p3 = scmp.lt.s32.totalorder (!%p289_p2), %s971_s13, 31 }
   0xb   : > { %v1090_v0 = vld [vmem:[%s1416_s1 + $0x8] sm:$0xff]  ;;  %v1089_v1 = vld [vmem:[%s1416_s1] sm:$0xff]  ;;  %s1426_s13 = smov (!%p325_p3, %s971_s13), 31  ;;  %vm381_vm0 = vcmask 261120   ;;  %v1098_v17 = vld [vmem:[%s1418_s3 + $0x38] sm:$0xff] }
   0xc   : > { %412 = vmatpush.bf16.msra.mxu0 %v1090_v0  ;;  %s972_s16 = sshll.u32 %s1426_s13, 3  ;;  %547 = vmatpush.bf16.msra.mxu1 %v1098_v17  ;;  %v1097_v21 = vld [vmem:[%s1418_s3 + $0x30] sm:$0xff]  ;;  %v1096_v22 = vld [vmem:[%s1418_s3 + $0x28] sm:$0xff]  ;;  %v1095_v23 = vld [vmem:[%s1418_s3 + $0x20] sm:$0xff] }
   0xd   : > { %s1252_s19 = scalar_lea.vmem %s1415_s0, %s972_s16  ;;  %v1094_v26 = vld [vmem:[%s1418_s3 + $0x18] sm:$0xff]  ;;  %v1093_v28 = vld [vmem:[%s1418_s3 + $0x10] sm:$0xff]  ;;  %v1092_v29 = vld [vmem:[%s1418_s3 + $0x8] sm:$0xff] }
   0xe   : > { %v337_v2 = vld [vmem:[%s1252_s19] sm:$0xff]  ;;  %v338_v3 = vld [vmem:[%s1252_s19 + $0x8] sm:$0xff]  ;;  %v339_v5 = vld [vmem:[%s1252_s19 + $0x10] sm:$0xff] }
   0xf   : > { %v353_v4 = vpack.c.bf16 %v338_v3, %v337_v2  ;;  %v340_v6 = vld [vmem:[%s1252_s19 + $0x18] sm:$0xff]  ;;  %v341_v8 = vld [vmem:[%s1252_s19 + $0x20] sm:$0xff]  ;;  %v342_v9 = vld [vmem:[%s1252_s19 + $0x28] sm:$0xff] }
  0x10   : > { %413 = vmatpush.bf16.msra.mxu0 %v1089_v1  ;;  %v354_v7 = vpack.c.bf16 %v340_v6, %v339_v5  ;;  %v355_v10 = vpack.c.bf16 %v342_v9, %v341_v8  ;;  %v343_v11 = vld [vmem:[%s1252_s19 + $0x30] sm:$0xff]  ;;  %v344_v12 = vld [vmem:[%s1252_s19 + $0x38] sm:$0xff]  ;;  %v345_v14 = vld [vmem:[%s1252_s19 + $0x40] sm:$0xff]  ;;  %548 = vmatpush.bf16.msra.mxu1 %v1097_v21 }
  0x11   : > { %v356_v13 = vpack.c.bf16 %v344_v12, %v343_v11  ;;  %v346_v15 = vld [vmem:[%s1252_s19 + $0x48] sm:$0xff]  ;;  %v347_v18 = vld [vmem:[%s1252_s19 + $0x50] sm:$0xff]  ;;  %v348_v19 = vld [vmem:[%s1252_s19 + $0x58] sm:$0xff] }
  0x12   : > { %v357_v16 = vpack.c.bf16 %v346_v15, %v345_v14  ;;  %v358_v20 = vpack.c.bf16 %v348_v19, %v347_v18  ;;  %v349_v24 = vld [vmem:[%s1252_s19 + $0x60] sm:$0xff]  ;;  %v350_v25 = vld [vmem:[%s1252_s19 + $0x68] sm:$0xff]  ;;  %v351_v31 = vld [vmem:[%s1252_s19 + $0x70] sm:$0xff] }
  0x13   : > { %983 = vmatmul.msk.bf16.vlgmr.msra.gmra.mxu0 %vm381_vm0, %v353_v4  ;;  %v359_v27 = vpack.c.bf16 %v350_v25, %v349_v24  ;;  %v1091_v30 = vld [vmem:[%s1418_s3] sm:$0xff]  ;;  %v352_v32 = vld [vmem:[%s1252_s19 + $0x78] sm:$0xff]  ;;  %v1105_v14 = vld [vmem:[%s1420_s5 + $0x30] sm:$0xff]  ;;  %s974_s19 = sshll.u32 %s1426_s13, 2 }
  0x14   : > { %549 = vmatpush.bf16.msra.mxu1 %v1096_v22  ;;  %v360_v33 = vpack.c.bf16 %v352_v32, %v351_v31  ;;  %v1305_v35 = vld [vmem:[%s1417_s2] ss:$0 sm:$0xff]  ;;  %v1102_v21 = vld [vmem:[%s1420_s5 + $0x18] sm:$0xff]  ;;  %v1101_v25 = vld [vmem:[%s1420_s5 + $0x10] sm:$0xff]  ;;  %s1402_s22 = scalar_lea.vmem %s1424_s9, %s974_s19 }
  0x15   : > { %v1103_v17 = vld [vmem:[%s1420_s5 + $0x20] sm:$0xff] }
  0x18   : > { %550 = vmatpush.bf16.msra.mxu1 %v1095_v23 }
  0x1c   : > { %551 = vmatpush.bf16.msra.mxu1 %v1094_v26 }
  0x20   : > { %552 = vmatpush.bf16.msra.mxu1 %v1093_v28  ;;  %v1099_v28 = vld [vmem:[%s1420_s5] sm:$0xff] }
  0x23   : > { %984 = vmatmul.msk.bf16.gmra.mxu0 %vm381_vm0, %v354_v7 }
  0x24   : > { %553 = vmatpush.bf16.msra.mxu1 %v1092_v29 }
  0x28   : > { %554 = vmatpush.bf16.msra.mxu1 %v1091_v30 }
  0x33   : > { %985 = vmatmul.msk.bf16.gmra.mxu0 %vm381_vm0, %v355_v10  ;;  %v1106_v10 = vld [vmem:[%s1420_s5 + $0x38] sm:$0xff] }
  0x34   : > { %688 = vmatpush.bf16.msra.mxu2 %v1106_v10 }
  0x38   : > { %689 = vmatpush.bf16.msra.mxu2 %v1105_v14  ;;  %v1114_v14 = vld [vmem:[%s1422_s7 + $0x38] sm:$0xff] }
  0x39   : > { %829 = vmatpush.bf16.msra.mxu3 %v1114_v14 }
  0x43   : > { %986 = vmatmul.msk.bf16.gmra.mxu0 %vm381_vm0, %v356_v13 }
  0x53   : > { %987 = vmatmul.msk.bf16.gmra.mxu0 %vm381_vm0, %v357_v16  ;;  %v1104_v16 = vld [vmem:[%s1420_s5 + $0x28] sm:$0xff] }
  0x54   : > { %690 = vmatpush.bf16.msra.mxu2 %v1104_v16  ;;  %v1113_v16 = vld [vmem:[%s1422_s7 + $0x30] sm:$0xff] }
  0x55   : > { %830 = vmatpush.bf16.msra.mxu3 %v1113_v16 }
  0x58   : > { %691 = vmatpush.bf16.msra.mxu2 %v1103_v17  ;;  %v1112_v17 = vld [vmem:[%s1422_s7 + $0x28] sm:$0xff] }
  0x59   : > { %831 = vmatpush.bf16.msra.mxu3 %v1112_v17 }
  0x5c   : > { %692 = vmatpush.bf16.msra.mxu2 %v1102_v21  ;;  %v1111_v21 = vld [vmem:[%s1422_s7 + $0x20] sm:$0xff] }
  0x5d   : > { %832 = vmatpush.bf16.msra.mxu3 %v1111_v21 }
  0x60   : > { %693 = vmatpush.bf16.msra.mxu2 %v1101_v25 }
  0x63   : > { %988 = vmatmul.msk.bf16.gmra.mxu0 %vm381_vm0, %v358_v20 }
  0x73   : > { %989 = vmatmul.msk.bf16.gmra.mxu0 %vm381_vm0, %v359_v27  ;;  %v1100_v27 = vld [vmem:[%s1420_s5 + $0x8] sm:$0xff] }
  0x74   : > { %694 = vmatpush.bf16.msra.mxu2 %v1100_v27  ;;  %v1109_v27 = vld [vmem:[%s1422_s7 + $0x10] sm:$0xff] }
  0x78   : > { %695 = vmatpush.bf16.msra.mxu2 %v1099_v28 }
  0x83   : > { %990 = vmatmul.msk.bf16.gmra.mxu0 %vm381_vm0, %v360_v33 }
  0x90   : > { %v415_v34 = vpop.f32.mrf.mxu0 }
  0x91   : > { %v416_v36 = vadd.f32 %v1305_v35, %v415_v34 }
  0x93   : > { %v455_v39 = vmax.f32 %v416_v36, 0.0 }
  0x98   : > { %v417_v37 = vpop.f32.mrf.mxu0 }
  0x99   : > { %v418_v38 = vadd.f32 %v1305_v35, %v417_v37  ;;  %v1350_v37 = vld [vmem:[%s1419_s4] ss:$0 sm:$0xff] }
  0x9b   : > { %v456_v40 = vmax.f32 %v418_v38, 0.0 }
  0x9d   : > { %v471_v41 = vpack.c.bf16 %v456_v40, %v455_v39 }
  0x9f   : > { %555 = vmatmul.bf16.vlgmr.msra.gmra.mxu1 %v471_v41 }
  0xa0   : > { %v420_v42 = vpop.f32.mrf.mxu0 }
  0xa1   : > { %v421_v43 = vadd.f32 %v1305_v35, %v420_v42 }
  0xa3   : > { %v457_v46 = vmax.f32 %v421_v43, 0.0 }
  0xa8   : > { %v422_v44 = vpop.f32.mrf.mxu0 }
  0xa9   : > { %v423_v45 = vadd.f32 %v1305_v35, %v422_v44 }
  0xab   : > { %v458_v47 = vmax.f32 %v423_v45, 0.0 }
  0xad   : > { %v472_v48 = vpack.c.bf16 %v458_v47, %v457_v46 }
  0xaf   : > { %560 = vmatmul.bf16.gmra.mxu1 %v472_v48 }
  0xb0   : > { %v425_v49 = vpop.f32.mrf.mxu0 }
  0xb1   : > { %v426_v50 = vadd.f32 %v1305_v35, %v425_v49 }
  0xb3   : > { %v459_v53 = vmax.f32 %v426_v50, 0.0 }
  0xb8   : > { %v427_v51 = vpop.f32.mrf.mxu0 }
  0xb9   : > { %v428_v52 = vadd.f32 %v1305_v35, %v427_v51 }
  0xbb   : > { %v460_v54 = vmax.f32 %v428_v52, 0.0 }
  0xbd   : > { %v473_v55 = vpack.c.bf16 %v460_v54, %v459_v53 }
  0xbf   : > { %565 = vmatmul.bf16.gmra.mxu1 %v473_v55 }
  0xc0   : > { %v430_v56 = vpop.f32.mrf.mxu0 }
  0xc1   : > { %v431_v57 = vadd.f32 %v1305_v35, %v430_v56 }
  0xc3   : > { %v461_v60 = vmax.f32 %v431_v57, 0.0 }
  0xc8   : > { %v432_v58 = vpop.f32.mrf.mxu0 }
  0xc9   : > { %v433_v59 = vadd.f32 %v1305_v35, %v432_v58 }
  0xcb   : > { %v462_v61 = vmax.f32 %v433_v59, 0.0 }
  0xcd   : > { %v474_v62 = vpack.c.bf16 %v462_v61, %v461_v60 }
  0xcf   : > { %570 = vmatmul.bf16.gmra.mxu1 %v474_v62 }
  0xd0   : > { %v435_v63 = vpop.f32.mrf.mxu0 }
  0xd1   : > { %v436_v0 = vadd.f32 %v1305_v35, %v435_v63 }
  0xd3   : > { %v463_v3 = vmax.f32 %v436_v0, 0.0 }
  0xd8   : > { %v437_v1 = vpop.f32.mrf.mxu0 }
  0xd9   : > { %v438_v2 = vadd.f32 %v1305_v35, %v437_v1 }
  0xdb   : > { %v464_v4 = vmax.f32 %v438_v2, 0.0 }
  0xdd   : > { %v475_v5 = vpack.c.bf16 %v464_v4, %v463_v3 }
  0xdf   : > { %575 = vmatmul.bf16.gmra.mxu1 %v475_v5 }
  0xe0   : > { %v440_v6 = vpop.f32.mrf.mxu0 }
  0xe1   : > { %v441_v7 = vadd.f32 %v1305_v35, %v440_v6 }
  0xe3   : > { %v465_v11 = vmax.f32 %v441_v7, 0.0 }
  0xe8   : > { %v442_v8 = vpop.f32.mrf.mxu0 }
  0xe9   : > { %v443_v9 = vadd.f32 %v1305_v35, %v442_v8 }
  0xeb   : > { %v466_v12 = vmax.f32 %v443_v9, 0.0 }
  0xed   : > { %v476_v13 = vpack.c.bf16 %v466_v12, %v465_v11 }
  0xef   : > { %580 = vmatmul.bf16.gmra.mxu1 %v476_v13 }
  0xf0   : > { %v445_v15 = vpop.f32.mrf.mxu0 }
  0xf1   : > { %v446_v18 = vadd.f32 %v1305_v35, %v445_v15 }
  0xf3   : > { %v467_v22 = vmax.f32 %v446_v18, 0.0 }
  0xf8   : > { %v447_v19 = vpop.f32.mrf.mxu0 }
  0xf9   : > { %v448_v20 = vadd.f32 %v1305_v35, %v447_v19 }
  0xfb   : > { %v468_v23 = vmax.f32 %v448_v20, 0.0 }
  0xfd   : > { %v477_v24 = vpack.c.bf16 %v468_v23, %v467_v22 }
  0xff   : > { %585 = vmatmul.bf16.gmra.mxu1 %v477_v24 }
 0x100   : > { %v450_v26 = vpop.f32.mrf.mxu0 }
 0x101   : > { %v451_v29 = vadd.f32 %v1305_v35, %v450_v26  ;;  %v1110_v26 = vld [vmem:[%s1422_s7 + $0x18] sm:$0xff] }
 0x102   : > { %833 = vmatpush.bf16.msra.mxu3 %v1110_v26 }
 0x103   : > { %v469_v32 = vmax.f32 %v451_v29, 0.0 }
 0x106   : > { %834 = vmatpush.bf16.msra.mxu3 %v1109_v27 }
 0x108   : > { %v452_v30 = vpop.f32.mrf.mxu0 }
 0x109   : > { %v453_v31 = vadd.f32 %v1305_v35, %v452_v30  ;;  %v1108_v30 = vld [vmem:[%s1422_s7 + $0x8] sm:$0xff] }
 0x10a   : > { %835 = vmatpush.bf16.msra.mxu3 %v1108_v30  ;;  %v1173_v30 = vld [vmem:[%s1423_s8] ss:$0 sm:$0xff] }
 0x10b   : > { %v470_v33 = vmax.f32 %v453_v31, 0.0 }
 0x10d   : > { %v478_v34 = vpack.c.bf16 %v470_v33, %v469_v32 }
 0x10f   : > { %590 = vmatmul.bf16.gmra.mxu1 %v478_v34  ;;  %v1107_v34 = vld [vmem:[%s1422_s7] sm:$0xff] }
 0x110   : > { %836 = vmatpush.bf16.msra.mxu3 %v1107_v34 }
 0x11c   : > { %v556_v36 = vpop.f32.mrf.mxu1 }
 0x11d   : > { %v557_v38 = vadd.f32 %v1350_v37, %v556_v36 }
 0x11f   : > { %v596_v41 = vmax.f32 %v557_v38, 0.0 }
 0x124   : > { %v558_v39 = vpop.f32.mrf.mxu1 }
 0x125   : > { %v559_v40 = vadd.f32 %v1350_v37, %v558_v39  ;;  %v1172_v39 = vld [vmem:[%s1421_s6] ss:$0 sm:$0xff] }
 0x127   : > { %v597_v42 = vmax.f32 %v559_v40, 0.0 }
 0x129   : > { %v612_v43 = vpack.c.bf16 %v597_v42, %v596_v41 }
 0x12b   : > { %696 = vmatmul.bf16.vlgmr.msra.gmra.mxu2 %v612_v43 }
 0x12c   : > { %v561_v35 = vpop.f32.mrf.mxu1 }
 0x12d   : > { %v562_v44 = vadd.f32 %v1350_v37, %v561_v35 }
 0x12f   : > { %v598_v47 = vmax.f32 %v562_v44, 0.0 }
 0x134   : > { %v563_v45 = vpop.f32.mrf.mxu1 }
 0x135   : > { %v564_v46 = vadd.f32 %v1350_v37, %v563_v45 }
 0x137   : > { %v599_v48 = vmax.f32 %v564_v46, 0.0 }
 0x139   : > { %v613_v49 = vpack.c.bf16 %v599_v48, %v598_v47 }
 0x13b   : > { %701 = vmatmul.bf16.gmra.mxu2 %v613_v49 }
 0x13c   : > { %v566_v50 = vpop.f32.mrf.mxu1 }
 0x13d   : > { %v567_v51 = vadd.f32 %v1350_v37, %v566_v50 }
 0x13f   : > { %v600_v54 = vmax.f32 %v567_v51, 0.0 }
 0x144   : > { %v568_v52 = vpop.f32.mrf.mxu1 }
 0x145   : > { %v569_v53 = vadd.f32 %v1350_v37, %v568_v52 }
 0x147   : > { %v601_v55 = vmax.f32 %v569_v53, 0.0 }
 0x149   : > { %v614_v56 = vpack.c.bf16 %v601_v55, %v600_v54 }
 0x14b   : > { %706 = vmatmul.bf16.gmra.mxu2 %v614_v56 }
 0x14c   : > { %v571_v57 = vpop.f32.mrf.mxu1 }
 0x14d   : > { %v572_v58 = vadd.f32 %v1350_v37, %v571_v57 }
 0x14f   : > { %v602_v61 = vmax.f32 %v572_v58, 0.0 }
 0x154   : > { %v573_v59 = vpop.f32.mrf.mxu1 }
 0x155   : > { %v574_v60 = vadd.f32 %v1350_v37, %v573_v59 }
 0x157   : > { %v603_v62 = vmax.f32 %v574_v60, 0.0 }
 0x159   : > { %v615_v63 = vpack.c.bf16 %v603_v62, %v602_v61 }
 0x15b   : > { %711 = vmatmul.bf16.gmra.mxu2 %v615_v63 }
 0x15c   : > { %v576_v0 = vpop.f32.mrf.mxu1 }
 0x15d   : > { %v577_v1 = vadd.f32 %v1350_v37, %v576_v0 }
 0x15f   : > { %v604_v4 = vmax.f32 %v577_v1, 0.0 }
 0x164   : > { %v578_v2 = vpop.f32.mrf.mxu1 }
 0x165   : > { %v579_v3 = vadd.f32 %v1350_v37, %v578_v2 }
 0x167   : > { %v605_v5 = vmax.f32 %v579_v3, 0.0 }
 0x169   : > { %v616_v6 = vpack.c.bf16 %v605_v5, %v604_v4 }
 0x16b   : > { %716 = vmatmul.bf16.gmra.mxu2 %v616_v6 }
 0x16c   : > { %v581_v7 = vpop.f32.mrf.mxu1 }
 0x16d   : > { %v582_v8 = vadd.f32 %v1350_v37, %v581_v7 }
 0x16f   : > { %v606_v11 = vmax.f32 %v582_v8, 0.0 }
 0x174   : > { %v583_v9 = vpop.f32.mrf.mxu1 }
 0x175   : > { %v584_v10 = vadd.f32 %v1350_v37, %v583_v9 }
 0x177   : > { %v607_v12 = vmax.f32 %v584_v10, 0.0 }
 0x179   : > { %v617_v13 = vpack.c.bf16 %v607_v12, %v606_v11 }
 0x17b   : > { %721 = vmatmul.bf16.gmra.mxu2 %v617_v13 }
 0x17c   : > { %v586_v15 = vpop.f32.mrf.mxu1 }
 0x17d   : > { %v587_v18 = vadd.f32 %v1350_v37, %v586_v15 }
 0x17f   : > { %v608_v22 = vmax.f32 %v587_v18, 0.0 }
 0x184   : > { %v588_v19 = vpop.f32.mrf.mxu1 }
 0x185   : > { %v589_v20 = vadd.f32 %v1350_v37, %v588_v19 }
 0x187   : > { %v609_v23 = vmax.f32 %v589_v20, 0.0 }
 0x189   : > { %v618_v24 = vpack.c.bf16 %v609_v23, %v608_v22 }
 0x18b   : > { %726 = vmatmul.bf16.gmra.mxu2 %v618_v24 }
 0x18c   : > { %v591_v25 = vpop.f32.mrf.mxu1 }
 0x18d   : > { %v592_v28 = vadd.f32 %v1350_v37, %v591_v25 }
 0x18f   : > { %v610_v32 = vmax.f32 %v592_v28, 0.0 }
 0x194   : > { %v593_v29 = vpop.f32.mrf.mxu1 }
 0x195   : > { %v594_v31 = vadd.f32 %v1350_v37, %v593_v29 }
 0x197   : > { %v611_v33 = vmax.f32 %v594_v31, 0.0 }
 0x199   : > { %v619_v36 = vpack.c.bf16 %v611_v33, %v610_v32 }
 0x19b   : > { %731 = vmatmul.bf16.gmra.mxu2 %v619_v36 }
 0x1ae   : > { %v697_v38 = vpop.f32.mrf.mxu2 }
 0x1af   : > { %v698_v40 = vadd.f32 %v1172_v39, %v697_v38 }
 0x1b1   : > { %v737_v43 = vmax.f32 %v698_v40, 0.0 }
 0x1b6   : > { %v699_v41 = vpop.f32.mrf.mxu2 }
 0x1b7   : > { %v700_v42 = vadd.f32 %v1172_v39, %v699_v41 }
 0x1b9   : > { %v738_v37 = vmax.f32 %v700_v42, 0.0 }
 0x1bb   : > { %v753_v35 = vpack.c.bf16 %v738_v37, %v737_v43 }
 0x1bd   : > { %837 = vmatmul.bf16.vlgmr.msra.gmra.mxu3 %v753_v35 }
 0x1be   : > { %v702_v44 = vpop.f32.mrf.mxu2 }
 0x1bf   : > { %v703_v45 = vadd.f32 %v1172_v39, %v702_v44 }
 0x1c1   : > { %v739_v48 = vmax.f32 %v703_v45, 0.0 }
 0x1c6   : > { %v704_v46 = vpop.f32.mrf.mxu2 }
 0x1c7   : > { %v705_v47 = vadd.f32 %v1172_v39, %v704_v46 }
 0x1c9   : > { %v740_v49 = vmax.f32 %v705_v47, 0.0 }
 0x1cb   : > { %v754_v50 = vpack.c.bf16 %v740_v49, %v739_v48 }
 0x1cd   : > { %842 = vmatmul.bf16.gmra.mxu3 %v754_v50 }
 0x1ce   : > { %v707_v51 = vpop.f32.mrf.mxu2 }
 0x1cf   : > { %v708_v52 = vadd.f32 %v1172_v39, %v707_v51 }
 0x1d1   : > { %v741_v55 = vmax.f32 %v708_v52, 0.0 }
 0x1d6   : > { %v709_v53 = vpop.f32.mrf.mxu2 }
 0x1d7   : > { %v710_v54 = vadd.f32 %v1172_v39, %v709_v53 }
 0x1d9   : > { %v742_v56 = vmax.f32 %v710_v54, 0.0 }
 0x1db   : > { %v755_v57 = vpack.c.bf16 %v742_v56, %v741_v55 }
 0x1dd   : > { %847 = vmatmul.bf16.gmra.mxu3 %v755_v57 }
 0x1de   : > { %v712_v58 = vpop.f32.mrf.mxu2 }
 0x1df   : > { %v713_v59 = vadd.f32 %v1172_v39, %v712_v58 }
 0x1e1   : > { %v743_v62 = vmax.f32 %v713_v59, 0.0 }
 0x1e6   : > { %v714_v60 = vpop.f32.mrf.mxu2 }
 0x1e7   : > { %v715_v61 = vadd.f32 %v1172_v39, %v714_v60 }
 0x1e9   : > { %v744_v63 = vmax.f32 %v715_v61, 0.0 }
 0x1eb   : > { %v756_v0 = vpack.c.bf16 %v744_v63, %v743_v62 }
 0x1ed   : > { %852 = vmatmul.bf16.gmra.mxu3 %v756_v0 }
 0x1ee   : > { %v717_v1 = vpop.f32.mrf.mxu2 }
 0x1ef   : > { %v718_v2 = vadd.f32 %v1172_v39, %v717_v1 }
 0x1f1   : > { %v745_v5 = vmax.f32 %v718_v2, 0.0 }
 0x1f6   : > { %v719_v3 = vpop.f32.mrf.mxu2 }
 0x1f7   : > { %v720_v4 = vadd.f32 %v1172_v39, %v719_v3 }
 0x1f9   : > { %v746_v6 = vmax.f32 %v720_v4, 0.0 }
 0x1fb   : > { %v757_v7 = vpack.c.bf16 %v746_v6, %v745_v5 }
 0x1fd   : > { %857 = vmatmul.bf16.gmra.mxu3 %v757_v7 }
 0x1fe   : > { %v722_v8 = vpop.f32.mrf.mxu2 }
 0x1ff   : > { %v723_v9 = vadd.f32 %v1172_v39, %v722_v8 }
 0x201   : > { %v747_v12 = vmax.f32 %v723_v9, 0.0 }
 0x206   : > { %v724_v10 = vpop.f32.mrf.mxu2 }
 0x207   : > { %v725_v11 = vadd.f32 %v1172_v39, %v724_v10 }
 0x209   : > { %v748_v13 = vmax.f32 %v725_v11, 0.0 }
 0x20b   : > { %v758_v14 = vpack.c.bf16 %v748_v13, %v747_v12 }
 0x20d   : > { %862 = vmatmul.bf16.gmra.mxu3 %v758_v14 }
 0x20e   : > { %v727_v15 = vpop.f32.mrf.mxu2 }
 0x20f   : > { %v728_v16 = vadd.f32 %v1172_v39, %v727_v15 }
 0x211   : > { %v749_v19 = vmax.f32 %v728_v16, 0.0 }
 0x216   : > { %v729_v17 = vpop.f32.mrf.mxu2 }
 0x217   : > { %v730_v18 = vadd.f32 %v1172_v39, %v729_v17 }
 0x219   : > { %v750_v20 = vmax.f32 %v730_v18, 0.0 }
 0x21b   : > { %v759_v21 = vpack.c.bf16 %v750_v20, %v749_v19 }
 0x21d   : > { %867 = vmatmul.bf16.gmra.mxu3 %v759_v21 }
 0x21e   : > { %v732_v22 = vpop.f32.mrf.mxu2 }
 0x21f   : > { %v733_v23 = vadd.f32 %v1172_v39, %v732_v22 }
 0x221   : > { %v751_v26 = vmax.f32 %v733_v23, 0.0 }
 0x226   : > { %v734_v24 = vpop.f32.mrf.mxu2 }
 0x227   : > { %v735_v25 = vadd.f32 %v1172_v39, %v734_v24 }
 0x229   : > { %v752_v27 = vmax.f32 %v735_v25, 0.0 }
 0x22b   : > { %v760_v28 = vpack.c.bf16 %v752_v27, %v751_v26 }
 0x22d   : > { %872 = vmatmul.bf16.gmra.mxu3 %v760_v28 }
 0x240   : > { %v838_v29 = vpop.f32.mrf.mxu3 }
 0x241   : > { %v839_v32 = vadd.f32 %v1173_v30, %v838_v29 }
 0x248   : > { %v840_v31 = vpop.f32.mrf.mxu3 }
 0x249   : > { %v841_v33 = vadd.f32 %v1173_v30, %v840_v31 }
 0x24b   : > { %v1118_v34 = vpack.c.bf16 %v841_v33, %v839_v32 }
 0x24d   : > { %1119 = vst [vmem:[%s1402_s22] sm:$0xff] %v1118_v34  }
 0x250   : > { %v843_v36 = vpop.f32.mrf.mxu3 }
 0x251   : > { %v844_v39 = vadd.f32 %v1173_v30, %v843_v36 }
 0x258   : > { %v845_v38 = vpop.f32.mrf.mxu3 }
 0x259   : > { %v846_v40 = vadd.f32 %v1173_v30, %v845_v38 }
 0x25b   : > { %v1123_v41 = vpack.c.bf16 %v846_v40, %v844_v39 }
 0x25d   : > { %1155 = vst [vmem:[%s1402_s22 + $0x8] sm:$0xff] %v1123_v41  }
 0x260   : > { %v848_v42 = vpop.f32.mrf.mxu3 }
 0x261   : > { %v849_v37 = vadd.f32 %v1173_v30, %v848_v42 }
 0x268   : > { %v850_v43 = vpop.f32.mrf.mxu3 }
 0x269   : > { %v851_v35 = vadd.f32 %v1173_v30, %v850_v43 }
 0x26b   : > { %v1128_v44 = vpack.c.bf16 %v851_v35, %v849_v37 }
 0x26d   : > { %1156 = vst [vmem:[%s1402_s22 + $0x10] sm:$0xff] %v1128_v44  }
 0x270   : > { %v853_v45 = vpop.f32.mrf.mxu3 }
 0x271   : > { %v854_v47 = vadd.f32 %v1173_v30, %v853_v45 }
 0x278   : > { %v855_v46 = vpop.f32.mrf.mxu3 }
 0x279   : > { %v856_v48 = vadd.f32 %v1173_v30, %v855_v46 }
 0x27b   : > { %v1133_v49 = vpack.c.bf16 %v856_v48, %v854_v47 }
 0x27d   : > { %1157 = vst [vmem:[%s1402_s22 + $0x18] sm:$0xff] %v1133_v49  }
 0x280   : > { %v858_v50 = vpop.f32.mrf.mxu3 }
 0x281   : > { %v859_v52 = vadd.f32 %v1173_v30, %v858_v50 }
 0x288   : > { %v860_v51 = vpop.f32.mrf.mxu3 }
 0x289   : > { %v861_v53 = vadd.f32 %v1173_v30, %v860_v51 }
 0x28b   : > { %v1138_v54 = vpack.c.bf16 %v861_v53, %v859_v52 }
 0x28d   : > { %1158 = vst [vmem:[%s1402_s22 + $0x20] sm:$0xff] %v1138_v54  }
 0x290   : > { %v863_v55 = vpop.f32.mrf.mxu3 }
 0x291   : > { %v864_v57 = vadd.f32 %v1173_v30, %v863_v55 }
 0x298   : > { %v865_v56 = vpop.f32.mrf.mxu3 }
 0x299   : > { %v866_v58 = vadd.f32 %v1173_v30, %v865_v56 }
 0x29b   : > { %v1143_v59 = vpack.c.bf16 %v866_v58, %v864_v57 }
 0x29d   : > { %1159 = vst [vmem:[%s1402_s22 + $0x28] sm:$0xff] %v1143_v59  }
 0x2a0   : > { %v868_v60 = vpop.f32.mrf.mxu3 }
 0x2a1   : > { %v869_v62 = vadd.f32 %v1173_v30, %v868_v60 }
 0x2a8   : > { %v870_v61 = vpop.f32.mrf.mxu3 }
 0x2a9   : > { %v871_v63 = vadd.f32 %v1173_v30, %v870_v61 }
 0x2ab   : > { %v1148_v0 = vpack.c.bf16 %v871_v63, %v869_v62 }
 0x2ad   : > { %1160 = vst [vmem:[%s1402_s22 + $0x30] sm:$0xff] %v1148_v0  }
 0x2b0   : > { %v873_v1 = vpop.f32.mrf.mxu3 }
 0x2b1   : > { %v874_v3 = vadd.f32 %v1173_v30, %v873_v1 }
 0x2b8   : > { %v875_v2 = vpop.f32.mrf.mxu3 }
 0x2b9   : > { %v876_v4 = vadd.f32 %v1173_v30, %v875_v2 }
 0x2bb   : > { %v1153_v5 = vpack.c.bf16 %v876_v4, %v874_v3 }
 0x2bd   : > { %1161 = vst [vmem:[%s1402_s22 + $0x38] sm:$0xff] %v1153_v5  }
 0x2be PF: > { %s19_s30 = sadd.s32 1, %s1180_s30  }
 0x2bf   : > { %p16_p4 = scmp.ge.s32.totalorder %s19_s30, 4  }
 0x2c1   :  { %18 = sbr.rel (!%p16_p4) target bundleno = 1 (0x1), region = 86 }

</bundles_post_ra>
